<compile_context>
chip_gen: v7x
topology: tpu7x:2x2x1
jax: 0.10.0
libtpu: 0.0.40
codegen_flags: <defaults>
</compile_context>

<pallas_src>
import jax
import jax.numpy as jnp
from jax.experimental import pallas as pl
from jax.experimental.pallas import tpu as pltpu

LANES = 128                     # vreg lane width — last dim of every block
_PER_STEP_BYTES = 8 << 20       # ~8 MiB of operand traffic per grid step
_VMEM_LIMIT_BYTES = 40 << 20    # explicit scoped-VMEM budget (v7x-safe)
_MIN_GRID_STEPS = 8             # keep pipeline full / megacore-shardable


def _sublane(dtype):
    # f32 -> 8, bf16/f16 -> 16, int8/fp8 -> 32 (packed sublane tiles)
    return max(8, 32 // jnp.dtype(dtype).itemsize)


def _round_up(a, b):
    return (a + b - 1) // b * b


# ----------------------------------------------------------------------------
# Kernels: fused multiply-add with precomputed coefficients in SMEM.
# Inputs are loaded in their native dtype, upcast to f32, stored in out dtype.
# ----------------------------------------------------------------------------
def _update_u_kernel(coef_ref, x_ref, hi_ref, rho_ref, o_ref):
    a = coef_ref[0]   # lambda1 / (lambda1 + lambda3)
    b = coef_ref[1]   # lambda3 / (lambda1 + lambda3)
    c = coef_ref[2]   # 1       / (lambda1 + lambda3)
    x = x_ref[...].astype(jnp.float32)
    h = hi_ref[...].astype(jnp.float32)
    r = rho_ref[...].astype(jnp.float32)
    o_ref[...] = (a * x + b * h + c * r).astype(o_ref.dtype)


def _update_u_kernel_scalar_rho(coef_ref, x_ref, hi_ref, o_ref):
    a = coef_ref[0]   # lambda1 / (lambda1 + lambda3)
    b = coef_ref[1]   # lambda3 / (lambda1 + lambda3)
    d = coef_ref[2]   # rho1    / (lambda1 + lambda3)  (scalar rho folded in)
    x = x_ref[...].astype(jnp.float32)
    h = hi_ref[...].astype(jnp.float32)
    o_ref[...] = (a * x + b * h + d).astype(o_ref.dtype)


# ----------------------------------------------------------------------------
# Wrapper
# ----------------------------------------------------------------------------
def _as_lanes(t):
    """Free reshape to (rows, 128); pads only the <128-element tail."""
    flat = t.reshape(-1)
    rem = flat.shape[0] % LANES
    if rem:
        flat = jnp.pad(flat, (0, LANES - rem))
    return flat.reshape(-1, LANES)


@jax.jit
def update_u(X, HI, lambda1, lambda3, rho1):
    """U = (lambda1 * X + lambda3 * HI + rho1) / (lambda1 + lambda3)."""
    lam1 = jnp.asarray(lambda1, jnp.float32)
    lam3 = jnp.asarray(lambda3, jnp.float32)
    inv = 1.0 / (lam1 + lam3)

    rho_is_scalar = jnp.ndim(rho1) == 0

    # Full PyTorch-style broadcast shape over all tensor operands.
    if rho_is_scalar:
        full_shape = jnp.broadcast_shapes(jnp.shape(X), jnp.shape(HI))
        out_dtype = jnp.result_type(X.dtype, HI.dtype)
        coefs = jnp.stack([lam1 * inv, lam3 * inv,
                           jnp.asarray(rho1, jnp.float32) * inv])
    else:
        full_shape = jnp.broadcast_shapes(jnp.shape(X), jnp.shape(HI),
                                          jnp.shape(rho1))
        out_dtype = jnp.result_type(X.dtype, HI.dtype, rho1.dtype)
        coefs = jnp.stack([lam1 * inv, lam3 * inv, inv])
    coefs = coefs.astype(jnp.float32)

    # Broadcasts are no-ops when shapes already match (the hot path).
    operands = [X if X.shape == full_shape else jnp.broadcast_to(X, full_shape),
                HI if HI.shape == full_shape else jnp.broadcast_to(HI, full_shape)]
    if not rho_is_scalar:
        operands.append(rho1 if rho1.shape == full_shape
                        else jnp.broadcast_to(rho1, full_shape))

    n = 1
    for s in full_shape:
        n *= int(s)

    # Lane-dense views (reshape is free; tail pad only when n % 128 != 0).
    views = [_as_lanes(t) for t in operands]
    rows = views[0].shape[0]
    tail_padded = rows * LANES != n

    # ---- block-size selection (all static under jit) -----------------------
    itemsizes = [jnp.dtype(t.dtype).itemsize for t in operands]
    out_itemsize = jnp.dtype(out_dtype).itemsize
    sub = max([_sublane(t.dtype) for t in operands] + [_sublane(out_dtype)])

    bytes_per_row = LANES * (sum(itemsizes) + out_itemsize)
    bm_cap = max(sub, (_PER_STEP_BYTES // bytes_per_row) // sub * sub)
    # Keep >= _MIN_GRID_STEPS steps for mid-size inputs (megacore / pipeline).
    bm = min(bm_cap, max(sub, _round_up(pl.cdiv(rows, _MIN_GRID_STEPS), sub)))
    bm = min(bm, _round_up(rows, sub))
    grid = (pl.cdiv(rows, bm),)

    tile = pl.BlockSpec((bm, LANES), lambda i: (i, 0))
    in_specs = [pl.BlockSpec(memory_space=pltpu.MemorySpace.SMEM)]  # coefs
    in_specs += [tile] * len(views)

    kernel = _update_u_kernel_scalar_rho if rho_is_scalar else _update_u_kernel

    out2d = pl.pallas_call(
        kernel,
        out_shape=jax.ShapeDtypeStruct((rows, LANES), out_dtype),
        grid=grid,
        in_specs=in_specs,
        out_specs=tile,
        compiler_params=pltpu.CompilerParams(
            dimension_semantics=("parallel",),
            vmem_limit_bytes=_VMEM_LIMIT_BYTES),
        cost_estimate=pl.CostEstimate(
            flops=5 * n,
            transcendentals=0,
            bytes_accessed=n * (sum(itemsizes) + out_itemsize)),
    )(coefs, *views)

    if tail_padded:
        return out2d.reshape(-1)[:n].reshape(full_shape)
    return out2d.reshape(full_shape)


# ----------------------------------------------------------------------------
# Pure-JAX reference (mirrors the PyTorch module)
# ----------------------------------------------------------------------------
def ref_update_u(X, HI, lambda1, lambda3, rho1):
    return (lambda1 * X + lambda3 * HI + rho1) / (lambda1 + lambda3)


# ----------------------------------------------------------------------------
# Main
# ----------------------------------------------------------------------------
if __name__ == "__main__":
    key = jax.random.PRNGKey(0)
    kx, kh, kr = jax.random.split(key, 3)

    N, C, H, W = 2, 4, 16, 16
    X = jax.random.normal(kx, (N, C, H, W), jnp.float32)
    HI = jax.random.normal(kh, (N, C, H, W), jnp.float32)
    rho1 = 0.1 * jax.random.normal(kr, (N, C, H, W), jnp.float32)
    lambda1 = jnp.float32(0.7)
    lambda3 = jnp.float32(0.4)

    # Full-tensor rho1 path.
    out = jax.block_until_ready(update_u(X, HI, lambda1, lambda3, rho1))
    ref = ref_update_u(X, HI, lambda1, lambda3, rho1)
    assert out.shape == ref.shape, (out.shape, ref.shape)
    max_err = float(jnp.max(jnp.abs(out - ref)))
    assert jnp.allclose(out, ref, atol=1e-5, rtol=1e-5), max_err

    # Scalar rho1 fast path (folded into SMEM coefficients).
    rho_s = jnp.float32(0.25)
    out_s = jax.block_until_ready(update_u(X, HI, lambda1, lambda3, rho_s))
    ref_s = ref_update_u(X, HI, lambda1, lambda3, rho_s)
    max_err_s = float(jnp.max(jnp.abs(out_s - ref_s)))
    assert jnp.allclose(out_s, ref_s, atol=1e-5, rtol=1e-5), max_err_s

    print("KERNEL_OK")
</pallas_src>

<mosaic_0001>
module attributes {stable_mosaic.version = 11 : i64} {
  func.func @_update_u_kernel(%arg0: i32, %arg1: memref<3xf32, #tpu.memory_space<smem>>, %arg2: memref<8x128xf32, #tpu.memory_space<vmem>>, %arg3: memref<8x128xf32, #tpu.memory_space<vmem>>, %arg4: memref<8x128xf32, #tpu.memory_space<vmem>>, %arg5: memref<8x128xf32, #tpu.memory_space<vmem>>) attributes {dimension_semantics = [#tpu.dimension_semantics<parallel>], iteration_bounds = array<i64: 2>, scalar_prefetch = 0 : i64, scratch_operands = 0 : i64, tpu.core_type = #tpu.core_type<tc>, window_params = [{transform_indices = @transform_0, window_bounds = array<i64: 3>}, {transform_indices = @transform_1, window_bounds = array<i64: 8, 128>}, {transform_indices = @transform_2, window_bounds = array<i64: 8, 128>}, {transform_indices = @transform_3, window_bounds = array<i64: 8, 128>}, {transform_indices = @transform_4, window_bounds = array<i64: 8, 128>}]} {
    %c0 = arith.constant 0 : index
    %0 = memref.load %arg1[%c0] : memref<3xf32, #tpu.memory_space<smem>>
    %c1 = arith.constant 1 : index
    %1 = memref.load %arg1[%c1] : memref<3xf32, #tpu.memory_space<smem>>
    %c2 = arith.constant 2 : index
    %2 = memref.load %arg1[%c2] : memref<3xf32, #tpu.memory_space<smem>>
    %c0_0 = arith.constant 0 : index
    %c0_1 = arith.constant 0 : index
    %3 = vector.load %arg2[%c0_0, %c0_1] : memref<8x128xf32, #tpu.memory_space<vmem>>, vector<8x128xf32>
    %c0_2 = arith.constant 0 : index
    %c0_3 = arith.constant 0 : index
    %4 = vector.load %arg3[%c0_2, %c0_3] : memref<8x128xf32, #tpu.memory_space<vmem>>, vector<8x128xf32>
    %c0_4 = arith.constant 0 : index
    %c0_5 = arith.constant 0 : index
    %5 = vector.load %arg4[%c0_4, %c0_5] : memref<8x128xf32, #tpu.memory_space<vmem>>, vector<8x128xf32>
    %6 = vector.broadcast %0 : f32 to vector<8x128xf32>
    %7 = arith.mulf %6, %3 : vector<8x128xf32>
    %8 = vector.broadcast %1 : f32 to vector<8x128xf32>
    %9 = arith.mulf %8, %4 : vector<8x128xf32>
    %10 = arith.addf %7, %9 : vector<8x128xf32>
    %11 = vector.broadcast %2 : f32 to vector<8x128xf32>
    %12 = arith.mulf %11, %5 : vector<8x128xf32>
    %13 = arith.addf %10, %12 : vector<8x128xf32>
    %c0_6 = arith.constant 0 : index
    %c0_7 = arith.constant 0 : index
    %14 = vector.load %arg5[%c0_6, %c0_7] : memref<8x128xf32, #tpu.memory_space<vmem>>, vector<8x128xf32>
    tpu.vector_store %arg5[%c0_6, %c0_7], %13 {strides = array<i32>} : memref<8x128xf32, #tpu.memory_space<vmem>>, vector<8x128xf32>,
    return
  }
  func.func @transform_0(%arg0: i32) -> i32 {
    %c0_i32 = arith.constant 0 : i32
    %c0_i32_0 = arith.constant 0 : i32
    return %c0_i32 : i32
  }
  func.func @transform_1(%arg0: i32) -> (i32, i32) {
    %c0_i32 = arith.constant 0 : i32
    %c0_i32_0 = arith.constant 0 : i32
    return %arg0, %c0_i32 : i32, i32
  }
  func.func @transform_2(%arg0: i32) -> (i32, i32) {
    %c0_i32 = arith.constant 0 : i32
    %c0_i32_0 = arith.constant 0 : i32
    return %arg0, %c0_i32 : i32, i32
  }
  func.func @transform_3(%arg0: i32) -> (i32, i32) {
    %c0_i32 = arith.constant 0 : i32
    %c0_i32_0 = arith.constant 0 : i32
    return %arg0, %c0_i32 : i32, i32
  }
  func.func @transform_4(%arg0: i32) -> (i32, i32) {
    %c0_i32 = arith.constant 0 : i32
    %c0_i32_0 = arith.constant 0 : i32
    return %arg0, %c0_i32 : i32, i32
  }
}

</mosaic_0001>

<bundles_post_ra>
// kernel: update_u.1
= control target key start
LH: loop header
LB: loop body
LE: loop exit
PB: predicated region body
PF: predicated region fallthrough
CT: control target
= control target key end

     0   :  { %9 = vsyncpa [#allocation3], 0  ;;  %s432_s15 = smov 0   ;;  %s469_s0 = inlined_call_operand.vmem [shape: f32[3], index: 0, kind: input, shape index: {}]   ;;  %s470_s1 = inlined_call_operand.vmem [shape: f32[16,128], index: 1, kind: input, shape index: {}]   ;;  %s471_s2 = inlined_call_operand.vmem [shape: f32[16,128], index: 2, kind: input, shape index: {}]   ;;  %s472_s3 = inlined_call_operand.vmem [shape: f32[16,128], index: 3, kind: input, shape index: {}]   ;;  %s473_s4 = inlined_call_operand.vmem [shape: f32[16,128], index: 4, kind: output, shape index: {}]  }
   0x1 LB: > { %s345_s16 = sadd.s32 4294967295, %s404_s15   ;;  %p347_p0 = scmp.ge.s32.totalorder %s404_s15, 1  ;;  %s404_s15 = sphi %s432_s15, %s15_s15  }
   0x2   : > { %p145_p1 = scmp.lt.s32.totalorder %s404_s15, 3  ;;  %s158_s19 = sshll.u32 %s469_s0, 4  ;;  %s159_s19 = int_to_ptr.vmem [resolvable:$true] %s158_s19 }
   0x3   : > { %p368_p3 = scmp.eq.s32.totalorder %s345_s16, 0  ;;  %s379_s21 = scalar_lea.vmem %s159_s19, 16 }
   0x4   : > { %p443_p2 = pnand %p347_p0, %p145_p1  ;;  %p380_p6 = scmp.ne.s32.totalorder %s159_s19, %s379_s21 }
   0x5   : > { %p387_p10 = scmp.lt.s32.totalorder %s159_s19, %s159_s19  ;;  %p388_p11 = scmp.lt.s32.totalorder %s379_s21, %s379_s21 }
   0x6   : > { %p364_p4 = pneg %p443_p2 }
   0x7   : > { %p389_p12 = por %p388_p11, %p387_p10 }
   0x8   : > { %p365_p5 = pnand %p368_p3, %p364_p4 }
   0xa   : > { %p381_p7 = pneg %p365_p5 }
   0xc   : > { %p382_p8 = pnand %p381_p7, %p380_p6 }
   0xe   : > { %p383_p9 = pneg %p382_p8 }
  0x10   : > { %p390_p13 = pnand %p389_p12, %p383_p9 }
  0x12   : > { %393 = shalt.err (!%p390_p13)
}
  0x13   : > { %s406_s22 = smov [#allocation2]   ;;  %192 = sbr.rel (%p443_p2) target bundleno = 44 (0x2c), region = 36 }
  0x14   : > { %367 = dma.vmem_to_smem (!%p365_p5), %s159_s19, 16, %s406_s22, [#allocation3]  }
  0x1a   : > { %399 = dma.done.wait (%p368_p3), [#allocation3], 16  }
  0x1b   : > { %401 = vsyncadd (%p368_p3), [#allocation3], 4294967280 }
  0x1c   : > { %198 = sfence }
  0x1d   : > { %p225_p0 = scmp.lt.s32.totalorder %s345_s16, 1  ;;  %s241_s23 = sld [smem:[#allocation2]] }
  0x1e   : > { %s356_s24 = sld [smem:[#allocation2 + $0x1]]  ;;  %s357_s25 = sld [smem:[#allocation2 + $0x2]] }
  0x1f   : > { %s476_s16 = smov (!%p225_p0, %s345_s16), 1 }
  0x20   : > { %s352_s26 = sshll.u32 %s476_s16, 3 }
  0x21   : > { %s228_s29 = scalar_lea.vmem %s470_s1, %s352_s26  ;;  %s232_s6 = scalar_lea.vmem %s471_s2, %s352_s26 }
  0x22   : > { %s236_s9 = scalar_lea.vmem %s472_s3, %s352_s26  ;;  %v244_v0 = vld [vmem:[%s228_s29] sm:$0xff]  ;;  %s240_s12 = scalar_lea.vmem %s473_s4, %s352_s26 }
  0x23   : > { %v245_v1 = vld [vmem:[%s232_s6] sm:$0xff]  ;;  %v247_v2 = vstv %s241_s23 }
  0x24   : > { %v246_v3 = vld [vmem:[%s236_s9] sm:$0xff]  ;;  %v248_v4 = vmul.f32 %v247_v2, %v244_v0  ;;  %v249_v5 = vstv %s356_s24  ;;  %v252_v6 = vstv %s357_s25 }
  0x25   : > { %v250_v7 = vmul.f32 %v249_v5, %v245_v1  ;;  %v253_v8 = vmul.f32 %v252_v6, %v246_v3 }
  0x27   : > { %v251_v9 = vadd.f32 %v250_v7, %v248_v4 }
  0x29   : > { %v254_v10 = vadd.f32 %v253_v8, %v251_v9 }
  0x2b   : > { %255 = vst [vmem:[%s240_s12] sm:$0xff] %v254_v10 }
  0x2c PF: > { %s15_s15 = sadd.s32 1, %s404_s15  }
  0x2d   : > { %p12_p1 = scmp.ge.s32.totalorder %s15_s15, 4  }
  0x2f   :  { %14 = sbr.rel (!%p12_p1) target bundleno = 1 (0x1), region = 77 }
  0x36   :  { %275 = vsyncpa [#allocation3], 1 }
  0x37   :  { %277 = vsyncpa [#allocation3 + $0x1], 1 }

</bundles_post_ra>
